<compile_context>
chip_gen: v7x
topology: tpu7x:2x2x1
jax: 0.10.0
libtpu: 0.0.40
codegen_flags: <defaults>
</compile_context>

<pallas_src>
import jax
import jax.numpy as jnp
from jax.experimental import pallas as pl
from jax.experimental.pallas import tpu as pltpu


def _round_up(x: int, m: int) -> int:
    return ((x + m - 1) // m) * m


def _choose_tiling(batch: int, max_tile: int):
    """Pick (tile_b, n_tiles): 1 tile if it fits, else an even tile count
    (megacore-friendly), every tile a multiple of 8 rows."""
    b8 = _round_up(batch, 8)
    if b8 <= max_tile:
        return b8, 1
    n_tiles = 2 * pl.cdiv(b8, 2 * max_tile)          # even count for 2-TC split
    b_pad = _round_up(batch, 8 * n_tiles)
    return b_pad // n_tiles, n_tiles


# ---------------------------------------------------------------------------
# Kernel
# ---------------------------------------------------------------------------
def actor_kernel(x_ref, w1_ref, w2_ref, w3_ref, b_ref, o_ref):
    """One batch tile of the 3-layer MLP.

    x_ref  : (tile_b, obs_pad)   f32   (cast to bf16 here, before the MXU)
    w1_ref : (obs_pad, H)        bf16
    w2_ref : (H, H)              bf16
    w3_ref : (H, act_pad)        bf16
    b_ref  : (3, max(H,act_pad)) f32   row0=b1, row1=b2, row2[:act_pad]=b3
    o_ref  : (tile_b, act_pad)   f32   (act_pad is a multiple of 128 -> lane-dense)
    """
    hidden = w2_ref.shape[0]
    act_pad = o_ref.shape[-1]

    x = x_ref[...].astype(jnp.bfloat16)

    # Layer 1: bf16 MXU matmul, f32 accumulate, f32 bias + ReLU.
    h1 = jnp.dot(x, w1_ref[...], preferred_element_type=jnp.float32)
    h1 = jnp.maximum(h1 + b_ref[0:1, :hidden], 0.0)

    # Layer 2.
    h2 = jnp.dot(h1.astype(jnp.bfloat16), w2_ref[...],
                 preferred_element_type=jnp.float32)
    h2 = jnp.maximum(h2 + b_ref[1:2, :hidden], 0.0)

    # Layer 3 (output, lane-dense act_pad columns).
    out = jnp.dot(h2.astype(jnp.bfloat16), w3_ref[...],
                  preferred_element_type=jnp.float32) + b_ref[2:3, :act_pad]

    o_ref[...] = out.astype(o_ref.dtype)


# ---------------------------------------------------------------------------
# Parameter packing (do ONCE per parameter set; reuse across forward calls)
# ---------------------------------------------------------------------------
def pack_actor_params(params):
    obs_dim, hidden = params["w1"].shape
    act_dim = params["w3"].shape[1]
    obs_pad = _round_up(obs_dim, 8)
    act_pad = _round_up(act_dim, 128)     # lane-dense output
    bias_w = max(hidden, act_pad)

    w1 = jnp.zeros((obs_pad, hidden), jnp.bfloat16)
    w1 = w1.at[:obs_dim, :].set(params["w1"].astype(jnp.bfloat16))
    w2 = params["w2"].astype(jnp.bfloat16)
    w3 = jnp.zeros((hidden, act_pad), jnp.bfloat16)
    w3 = w3.at[:, :act_dim].set(params["w3"].astype(jnp.bfloat16))

    biases = jnp.zeros((3, bias_w), jnp.float32)
    biases = biases.at[0, :hidden].set(params["b1"].reshape(-1))
    biases = biases.at[1, :hidden].set(params["b2"].reshape(-1))
    biases = biases.at[2, :act_dim].set(params["b3"].reshape(-1))

    return {"w1": w1, "w2": w2, "w3": w3, "biases": biases,
            "obs_dim": obs_dim, "act_dim": act_dim, "hidden": hidden,
            "obs_pad": obs_pad, "act_pad": act_pad}


# ---------------------------------------------------------------------------
# Forward wrapper
# ---------------------------------------------------------------------------
def actor_forward(state, packed, *, max_tile=2048):
    """state: (B, obs_dim) f32.  packed: output of pack_actor_params.
    Returns (B, act_dim) f32 == PyTorch Actor.forward (up to bf16 operand
    rounding on the MXU)."""
    B, obs_dim = state.shape
    assert obs_dim == packed["obs_dim"]
    hidden, obs_pad, act_pad, act_dim = (packed["hidden"], packed["obs_pad"],
                                         packed["act_pad"], packed["act_dim"])

    tile_b, n_tiles = _choose_tiling(B, max_tile)
    b_pad = tile_b * n_tiles

    x = state
    if b_pad != B or obs_pad != obs_dim:
        # Single f32 pad when needed; bf16 cast happens inside the kernel.
        x = jnp.pad(state, ((0, b_pad - B), (0, obs_pad - obs_dim)))

    # Advisory cost estimate: weights counted once (resident via constant
    # index_map), activations in their real f32 input dtype.
    flops = 2 * b_pad * (obs_pad * hidden + hidden * hidden + hidden * act_pad)
    bytes_accessed = (b_pad * obs_pad * 4                      # state (f32 in)
                      + packed["w1"].size * 2 + packed["w2"].size * 2
                      + packed["w3"].size * 2                  # weights, once
                      + packed["biases"].size * 4
                      + b_pad * act_pad * 4)                   # output

    out_padded = pl.pallas_call(
        actor_kernel,
        out_shape=jax.ShapeDtypeStruct((b_pad, act_pad), jnp.float32),
        grid_spec=pltpu.PrefetchScalarGridSpec(
            num_scalar_prefetch=0,
            grid=(n_tiles,),
            in_specs=[
                # Batch-tiled activations (pipelined when n_tiles > 1).
                pl.BlockSpec((tile_b, obs_pad), lambda i: (i, 0)),
                # Weights + packed biases: constant block index -> DMA'd once,
                # resident in VMEM across all batch tiles.
                pl.BlockSpec((obs_pad, hidden), lambda i: (0, 0)),
                pl.BlockSpec((hidden, hidden), lambda i: (0, 0)),
                pl.BlockSpec((hidden, act_pad), lambda i: (0, 0)),
                pl.BlockSpec(packed["biases"].shape, lambda i: (0, 0)),
            ],
            out_specs=pl.BlockSpec((tile_b, act_pad), lambda i: (i, 0)),
        ),
        compiler_params=pltpu.CompilerParams(
            dimension_semantics=("parallel",)),   # 2-tile grids split across v7x TCs
        cost_estimate=pl.CostEstimate(
            flops=flops, transcendentals=0, bytes_accessed=bytes_accessed),
    )(x, packed["w1"], packed["w2"], packed["w3"], packed["biases"])

    return out_padded[:B, :act_dim]


# ---------------------------------------------------------------------------
# Init + references + self-test
# ---------------------------------------------------------------------------
def init_actor_params(key, obs_dim, act_dim, hidden=256):
    """Deterministic init mimicking nn.Linear default (uniform +/- 1/sqrt(fan_in))."""
    ks = jax.random.split(key, 6)

    def linear(kw, kb, fan_in, fan_out):
        bound = 1.0 / jnp.sqrt(fan_in)
        w = jax.random.uniform(kw, (fan_in, fan_out), jnp.float32, -bound, bound)
        b = jax.random.uniform(kb, (1, fan_out), jnp.float32, -bound, bound)
        return w, b

    w1, b1 = linear(ks[0], ks[1], obs_dim, hidden)
    w2, b2 = linear(ks[2], ks[3], hidden, hidden)
    w3, b3 = linear(ks[4], ks[5], hidden, act_dim)
    return {"w1": w1, "b1": b1, "w2": w2, "b2": b2, "w3": w3, "b3": b3}


def actor_reference_f32(state, p):
    h1 = jnp.maximum(state @ p["w1"] + p["b1"], 0.0)
    h2 = jnp.maximum(h1 @ p["w2"] + p["b2"], 0.0)
    return h2 @ p["w3"] + p["b3"]


def actor_reference_bf16(state, p):
    """Reference matching the kernel's bf16-operand / f32-accumulate math."""
    bf = jnp.bfloat16
    h1 = jnp.maximum(
        jnp.dot(state.astype(bf), p["w1"].astype(bf),
                preferred_element_type=jnp.float32) + p["b1"], 0.0)
    h2 = jnp.maximum(
        jnp.dot(h1.astype(bf), p["w2"].astype(bf),
                preferred_element_type=jnp.float32) + p["b2"], 0.0)
    return jnp.dot(h2.astype(bf), p["w3"].astype(bf),
                   preferred_element_type=jnp.float32) + p["b3"]


if __name__ == "__main__":
    key = jax.random.PRNGKey(0)
    k_params, k_state1, k_state2 = jax.random.split(key, 3)

    obs_dim, act_dim = 17, 6  # HalfCheetah-like dims; hidden=256 per the module
    params = init_actor_params(k_params, obs_dim, act_dim)
    packed = pack_actor_params(params)   # packed ONCE, reused by every forward

    # Small batch: single grid step (grid of 1, weights + batch in one tile).
    state_small = jax.random.normal(k_state1, (8, obs_dim), jnp.float32)
    out_small = jax.block_until_ready(actor_forward(state_small, packed))
    assert out_small.shape == (8, act_dim)
    assert jnp.allclose(out_small, actor_reference_bf16(state_small, params),
                        atol=5e-3, rtol=5e-3), "mismatch vs bf16 reference (small)"
    assert jnp.allclose(out_small, actor_reference_f32(state_small, params),
                        atol=5e-2, rtol=5e-2), "mismatch vs f32 reference (small)"

    # Larger batch with a smaller max_tile: exercises batch padding + the
    # even (2-tile) megacore grid path with resident weights.
    state_big = jax.random.normal(k_state2, (1000, obs_dim), jnp.float32)
    out_big = jax.block_until_ready(actor_forward(state_big, packed, max_tile=512))
    assert out_big.shape == (1000, act_dim)
    assert jnp.allclose(out_big, actor_reference_bf16(state_big, params),
                        atol=5e-3, rtol=5e-3), "mismatch vs bf16 reference (big)"
    assert jnp.allclose(out_big, actor_reference_f32(state_big, params),
                        atol=5e-2, rtol=5e-2), "mismatch vs f32 reference (big)"

    print("KERNEL_OK")
</pallas_src>

<mosaic_0001>
module attributes {stable_mosaic.version = 11 : i64} {
  func.func @actor_kernel(%arg0: i32, %arg1: memref<8x24xf32, #tpu.memory_space<vmem>>, %arg2: memref<24x256xbf16, #tpu.memory_space<vmem>>, %arg3: memref<256x256xbf16, #tpu.memory_space<vmem>>, %arg4: memref<256x128xbf16, #tpu.memory_space<vmem>>, %arg5: memref<3x256xf32, #tpu.memory_space<vmem>>, %arg6: memref<8x128xf32, #tpu.memory_space<vmem>>) attributes {dimension_semantics = [#tpu.dimension_semantics<parallel>], iteration_bounds = array<i64: 1>, scalar_prefetch = 0 : i64, scratch_operands = 0 : i64, tpu.core_type = #tpu.core_type<tc>, window_params = [{transform_indices = @transform_0, window_bounds = array<i64: 8, 24>}, {pipeline_mode = #tpu.pipeline_mode<synchronous>, transform_indices = @transform_1, window_bounds = array<i64: 24, 256>}, {pipeline_mode = #tpu.pipeline_mode<synchronous>, transform_indices = @transform_2, window_bounds = array<i64: 256, 256>}, {pipeline_mode = #tpu.pipeline_mode<synchronous>, transform_indices = @transform_3, window_bounds = array<i64: 256, 128>}, {pipeline_mode = #tpu.pipeline_mode<synchronous>, transform_indices = @transform_4, window_bounds = array<i64: 3, 256>}, {transform_indices = @transform_5, window_bounds = array<i64: 8, 128>}]} {
    %c0 = arith.constant 0 : index
    %c0_0 = arith.constant 0 : index
    %0 = vector.load %arg1[%c0, %c0_0] : memref<8x24xf32, #tpu.memory_space<vmem>>, vector<8x24xf32>
    %1 = arith.truncf %0 : vector<8x24xf32> to vector<8x24xbf16>
    %c0_1 = arith.constant 0 : index
    %c0_2 = arith.constant 0 : index
    %2 = vector.load %arg2[%c0_1, %c0_2] : memref<24x256xbf16, #tpu.memory_space<vmem>>, vector<24x256xbf16>
    %cst = arith.constant dense<0.000000e+00> : vector<8x256xf32>
    %3 = tpu.matmul %1, %2, %cst {dimension_numbers = #tpu.dot_dimension_numbers<[1], [0], [0], [1], [0, 0, 1, 1], [], []>} : vector<8x24xbf16>, vector<24x256xbf16>, vector<8x256xf32> -> vector<8x256xf32>
    %c0_3 = arith.constant 0 : index
    %c0_4 = arith.constant 0 : index
    %4 = vector.load %arg5[%c0_3, %c0_4] : memref<3x256xf32, #tpu.memory_space<vmem>>, vector<1x256xf32>
    %5 = vector.broadcast %4 : vector<1x256xf32> to vector<8x256xf32>
    %6 = arith.addf %3, %5 : vector<8x256xf32>
    %cst_5 = arith.constant 0.000000e+00 : f32
    %7 = vector.broadcast %cst_5 : f32 to vector<8x256xf32>
    %8 = arith.maximumf %6, %7 : vector<8x256xf32>
    %9 = arith.truncf %8 : vector<8x256xf32> to vector<8x256xbf16>
    %c0_6 = arith.constant 0 : index
    %c0_7 = arith.constant 0 : index
    %10 = vector.load %arg3[%c0_6, %c0_7] : memref<256x256xbf16, #tpu.memory_space<vmem>>, vector<256x256xbf16>
    %cst_8 = arith.constant dense<0.000000e+00> : vector<8x256xf32>
    %11 = tpu.matmul %9, %10, %cst_8 {dimension_numbers = #tpu.dot_dimension_numbers<[1], [0], [0], [1], [0, 0, 1, 1], [], []>} : vector<8x256xbf16>, vector<256x256xbf16>, vector<8x256xf32> -> vector<8x256xf32>
    %c1 = arith.constant 1 : index
    %c0_9 = arith.constant 0 : index
    %12 = vector.load %arg5[%c1, %c0_9] : memref<3x256xf32, #tpu.memory_space<vmem>>, vector<1x256xf32>
    %13 = vector.broadcast %12 : vector<1x256xf32> to vector<8x256xf32>
    %14 = arith.addf %11, %13 : vector<8x256xf32>
    %cst_10 = arith.constant 0.000000e+00 : f32
    %15 = vector.broadcast %cst_10 : f32 to vector<8x256xf32>
    %16 = arith.maximumf %14, %15 : vector<8x256xf32>
    %17 = arith.truncf %16 : vector<8x256xf32> to vector<8x256xbf16>
    %c0_11 = arith.constant 0 : index
    %c0_12 = arith.constant 0 : index
    %18 = vector.load %arg4[%c0_11, %c0_12] : memref<256x128xbf16, #tpu.memory_space<vmem>>, vector<256x128xbf16>
    %cst_13 = arith.constant dense<0.000000e+00> : vector<8x128xf32>
    %19 = tpu.matmul %17, %18, %cst_13 {dimension_numbers = #tpu.dot_dimension_numbers<[1], [0], [0], [1], [0, 0, 1, 1], [], []>} : vector<8x256xbf16>, vector<256x128xbf16>, vector<8x128xf32> -> vector<8x128xf32>
    %c2 = arith.constant 2 : index
    %c0_14 = arith.constant 0 : index
    %20 = vector.load %arg5[%c2, %c0_14] : memref<3x256xf32, #tpu.memory_space<vmem>>, vector<1x128xf32>
    %21 = vector.broadcast %20 : vector<1x128xf32> to vector<8x128xf32>
    %22 = arith.addf %19, %21 : vector<8x128xf32>
    %c0_15 = arith.constant 0 : index
    %c0_16 = arith.constant 0 : index
    %23 = vector.load %arg6[%c0_15, %c0_16] : memref<8x128xf32, #tpu.memory_space<vmem>>, vector<8x128xf32>
    tpu.vector_store %arg6[%c0_15, %c0_16], %22 {strides = array<i32>} : memref<8x128xf32, #tpu.memory_space<vmem>>, vector<8x128xf32>,
    return
  }
  func.func @transform_0(%arg0: i32) -> (i32, i32) {
    %c0_i32 = arith.constant 0 : i32
    %c0_i32_0 = arith.constant 0 : i32
    return %arg0, %c0_i32 : i32, i32
  }
  func.func @transform_1(%arg0: i32) -> (i32, i32) {
    %c0_i32 = arith.constant 0 : i32
    %c0_i32_0 = arith.constant 0 : i32
    %c0_i32_1 = arith.constant 0 : i32
    return %c0_i32, %c0_i32_0 : i32, i32
  }
  func.func @transform_2(%arg0: i32) -> (i32, i32) {
    %c0_i32 = arith.constant 0 : i32
    %c0_i32_0 = arith.constant 0 : i32
    %c0_i32_1 = arith.constant 0 : i32
    return %c0_i32, %c0_i32_0 : i32, i32
  }
  func.func @transform_3(%arg0: i32) -> (i32, i32) {
    %c0_i32 = arith.constant 0 : i32
    %c0_i32_0 = arith.constant 0 : i32
    %c0_i32_1 = arith.constant 0 : i32
    return %c0_i32, %c0_i32_0 : i32, i32
  }
  func.func @transform_4(%arg0: i32) -> (i32, i32) {
    %c0_i32 = arith.constant 0 : i32
    %c0_i32_0 = arith.constant 0 : i32
    %c0_i32_1 = arith.constant 0 : i32
    return %c0_i32, %c0_i32_0 : i32, i32
  }
  func.func @transform_5(%arg0: i32) -> (i32, i32) {
    %c0_i32 = arith.constant 0 : i32
    %c0_i32_0 = arith.constant 0 : i32
    return %arg0, %c0_i32 : i32, i32
  }
}

</mosaic_0001>

<bundles_post_ra>
// kernel: tpu_custom_call.1
= control target key start
LH: loop header
LB: loop body
LE: loop exit
PB: predicated region body
PF: predicated region fallthrough
CT: control target
= control target key end

     0   :  { %10 = vsyncpa [#allocation3], 0  ;;  %s994_s0 = inlined_call_operand.hbm [shape: f32[8,24], index: 0, kind: input, shape index: {}]   ;;  %s995_s1 = inlined_call_operand.hbm [shape: bf16[24,256], index: 1, kind: input, shape index: {}]   ;;  %s996_s2 = inlined_call_operand.hbm [shape: bf16[256,256], index: 2, kind: input, shape index: {}]   ;;  %s997_s3 = inlined_call_operand.hbm [shape: bf16[256,128], index: 3, kind: input, shape index: {}]   ;;  %s998_s4 = inlined_call_operand.vmem [shape: f32[3,256], index: 4, kind: input, shape index: {}]   ;;  %s999_s5 = inlined_call_operand.hbm [shape: f32[8,128], index: 5, kind: output, shape index: {}]  }
   0x1   :  { %11 = vsyncpa [#allocation6], 0 }
   0x2   :  { %12 = vsyncpa [#allocation9], 0 }
   0x3   :  { %13 = vsyncpa [#allocation4], 0  ;;  %s879_s18 = smov [#allocation5]   ;;  %s761_s22 = scalar_lea.hbm %s995_s1, 384 }
   0x4   :  { %s29_s19 = sshll.u32 %s879_s18, 4  ;;  %p762_p0 = scmp.ne.s32.totalorder %s995_s1, %s761_s22  ;;  %s30_s19 = int_to_ptr.vmem [resolvable:$true] %s29_s19 }
   0x5   :  { %p765_p1 = scmp.lt.u32.totalorder %s761_s22, %s995_s1 }
   0x7   :  { %p767_p2 = pnand %p765_p1, %p762_p0 }
   0x9   :  { %770 = shalt.err (!%p767_p2)
}
   0xa   :  { %s771_s27 = scalar_lea.vmem %s30_s19, 384  ;;  %p776_p4 = scmp.lt.s32.totalorder %s30_s19, %s30_s19 }
   0xb   :  { %p772_p3 = scmp.ne.s32.totalorder %s30_s19, %s771_s27  ;;  %p777_p5 = scmp.lt.s32.totalorder %s771_s27, %s771_s27 }
   0xd   :  { %p778_p6 = por %p777_p5, %p776_p4 }
   0xf   :  { %p779_p7 = pnand %p778_p6, %p772_p3 }
  0x11   :  { %782 = shalt.err (!%p779_p7)
}
  0x12   :  { %s880_s28 = smov 128   ;;  %s881_s29 = smov 8  }
  0x13   :  { %35 = dma.hbm_to_vmem [thread:$0]  %s995_s1, 384, %s30_s19, [#allocation6], %s880_s28, %s880_s28, %s881_s29  }
  0x14   :  { %s882_s7 = smov [#allocation2]   ;;  %s883_s9 = smov [#allocation7]  }
  0x15   :  { %s20_s8 = sshll.u32 %s882_s7, 4  ;;  %s41_s10 = sshll.u32 %s883_s9, 4  ;;  %s21_s8 = int_to_ptr.vmem [resolvable:$true] %s20_s8  ;;  %s42_s10 = int_to_ptr.vmem [resolvable:$true] %s41_s10 }
  0x16   :  { %s783_s13 = scalar_lea.hbm %s994_s0, 128 }
  0x17   :  { %p784_p8 = scmp.ne.s32.totalorder %s994_s0, %s783_s13  ;;  %p787_p9 = scmp.lt.u32.totalorder %s783_s13, %s994_s0 }
  0x19   :  { %p789_p10 = pnand %p787_p9, %p784_p8 }
  0x1b   :  { %792 = shalt.err (!%p789_p10)
}
  0x1c   :  { %s793_s1 = scalar_lea.vmem %s21_s8, 128  ;;  %p798_p12 = scmp.lt.s32.totalorder %s21_s8, %s21_s8 }
  0x1d   :  { %p794_p11 = scmp.ne.s32.totalorder %s21_s8, %s793_s1  ;;  %p799_p13 = scmp.lt.s32.totalorder %s793_s1, %s793_s1 }
  0x1f   :  { %p800_p0 = por %p799_p13, %p798_p12 }
  0x21   :  { %p801_p1 = pnand %p800_p0, %p794_p11 }
  0x23   :  { %804 = shalt.err (!%p801_p1)
}
  0x24   :  { %23 = dma.hbm_to_vmem [thread:$0]  %s994_s0, 128, %s21_s8, [#allocation3]  }
  0x25   :  { %s805_s22 = scalar_lea.hbm %s996_s2, 4096 }
  0x26   :  { %p806_p2 = scmp.ne.s32.totalorder %s996_s2, %s805_s22  ;;  %p809_p3 = scmp.lt.u32.totalorder %s805_s22, %s996_s2 }
  0x28   :  { %p811_p4 = pnand %p809_p3, %p806_p2 }
  0x2a   :  { %814 = shalt.err (!%p811_p4)
}
  0x2b   :  { %s815_s27 = scalar_lea.vmem %s42_s10, 4096  ;;  %p820_p6 = scmp.lt.s32.totalorder %s42_s10, %s42_s10 }
  0x2c   :  { %p816_p5 = scmp.ne.s32.totalorder %s42_s10, %s815_s27  ;;  %p821_p7 = scmp.lt.s32.totalorder %s815_s27, %s815_s27 }
  0x2e   :  { %p822_p8 = por %p821_p7, %p820_p6 }
  0x30   :  { %p823_p9 = pnand %p822_p8, %p816_p5 }
  0x32   :  { %826 = shalt.err (!%p823_p9)
}
  0x33   :  { %47 = dma.hbm_to_vmem [thread:$0]  %s996_s2, 4096, %s42_s10, [#allocation6], %s880_s28, %s880_s28, %s881_s29  }
  0x34   :  { %s884_s6 = smov [#allocation8]   ;;  %s827_s11 = scalar_lea.hbm %s997_s3, 2048 }
  0x35   :  { %s53_s7 = sshll.u32 %s884_s6, 4  ;;  %p828_p10 = scmp.ne.s32.totalorder %s997_s3, %s827_s11  ;;  %s54_s7 = int_to_ptr.vmem [resolvable:$true] %s53_s7 }
  0x36   :  { %p831_p11 = scmp.lt.u32.totalorder %s827_s11, %s997_s3 }
  0x38   :  { %p833_p12 = pnand %p831_p11, %p828_p10 }
  0x3a   :  { %836 = shalt.err (!%p833_p12)
}
  0x3b   :  { %s837_s16 = scalar_lea.vmem %s54_s7, 2048  ;;  %p842_p0 = scmp.lt.s32.totalorder %s54_s7, %s54_s7 }
  0x3c   :  { %p838_p13 = scmp.ne.s32.totalorder %s54_s7, %s837_s16  ;;  %p843_p1 = scmp.lt.s32.totalorder %s837_s16, %s837_s16 }
  0x3e   :  { %p844_p2 = por %p843_p1, %p842_p0 }
  0x40   :  { %p845_p3 = pnand %p844_p2, %p838_p13 }
  0x42   :  { %848 = shalt.err (!%p845_p3)
}
  0x43   :  { %s885_s2 = smov 64   ;;  %s886_s28 = smov 4  }
  0x44   :  { %59 = dma.hbm_to_vmem [thread:$0]  %s997_s3, 2048, %s54_s7, [#allocation9], %s885_s2, %s885_s2, %s886_s28  }
  0x45   :  { %871 = dma.done.wait [#allocation3], 128  }
  0x46   :  { %872 = vsyncadd [#allocation3], 4294967168 }
  0x47   :  { %873 = dma.done.wait [#allocation6], 4480  }
  0x48   :  { %874 = vsyncadd [#allocation6], 4294962816 }
  0x49   :  { %875 = dma.done.wait [#allocation9], 2048  }
  0x4a   :  { %876 = vsyncadd [#allocation9], 4294965248  ;;  %v887_v0 = vmov 0   ;;  %v692_v1 = vld [vmem:[#allocation5 + $0x4] ss:$8 sps:$4 sm:$0xff]   ;;  %v79_v3 = vld [vmem:[#allocation5 + $0x10] sm:$0xff]  ;;  %v82_v53 = vlaneseq }
  0x4b   :  { %150 = vmatprep.mubr.bf16.mxu0 %v887_v0  ;;  %v694_v2 = vld [vmem:[#allocation5] ss:$8 sps:$4 sm:$0xff]   ;;  %vm111_vm0 = vcmask 1043456   ;;  %v75_v4 = vld [vmem:[#allocation2] sm:$0xff]  ;;  %118 = vmatprep.subr.bf16.mxu0 %v692_v1  ;;  %v607_v5 = vcombine.high %v79_v3, %v79_v3  ;;  %v606_v6 = vcombine.low %v79_v3, %v79_v3  ;;  %v700_v10 = vld [vmem:[#allocation7 + $0x14] ss:$8 sps:$4 sm:$0xff]  }
  0x4c   :  { %v697_v7 = vld [vmem:[#allocation7 + $0x4] ss:$8 sps:$4 sm:$0xff]   ;;  %119 = vmatpush1.bf16.msra.mxu0 %v694_v2  ;;  %v699_v8 = vld [vmem:[#allocation7] ss:$8 sps:$4 sm:$0xff]   ;;  %v702_v11 = vld [vmem:[#allocation7 + $0x10] ss:$8 sps:$4 sm:$0xff]   ;;  %v76_v12 = vpack.c.bf16 %v75_v4, %v75_v4 }
  0x4d   :  { %608 = vmatprep.subr.msk.bf16.mxu0 %vm111_vm0, %v607_v5  ;;  %v113_v9 = vsel %vm111_vm0, %v606_v6, 0  ;;  %368 = vmatprep.subr.bf16.mxu1 %v697_v7  ;;  %v703_v13 = vld [vmem:[#allocation7 + $0x24] ss:$8 sps:$4 sm:$0xff]   ;;  %vm107_vm1 = vcmask 195584   ;;  %v705_v14 = vld [vmem:[#allocation7 + $0x20] ss:$8 sps:$4 sm:$0xff]  }
  0x4e   :  { %369 = vmatpush1.bf16.msra.mxu1 %v699_v8  ;;  %v706_v15 = vld [vmem:[#allocation7 + $0x34] ss:$8 sps:$4 sm:$0xff]   ;;  %v708_v16 = vld [vmem:[#allocation7 + $0x30] ss:$8 sps:$4 sm:$0xff]   ;;  %v709_v17 = vld [vmem:[#allocation7 + $0x44] ss:$8 sps:$4 sm:$0xff]  }
  0x4f   :  { %370 = vmatprep.subr.bf16.mxu1 %v700_v10  ;;  %v711_v18 = vld [vmem:[#allocation7 + $0x40] ss:$8 sps:$4 sm:$0xff]   ;;  %v712_v19 = vld [vmem:[#allocation7 + $0x54] ss:$8 sps:$4 sm:$0xff]   ;;  %v714_v20 = vld [vmem:[#allocation7 + $0x50] ss:$8 sps:$4 sm:$0xff]  }
  0x50   :  { %121 = vmatpush1.bf16.msra.mxu0 %v113_v9  ;;  %v715_v21 = vld [vmem:[#allocation7 + $0x64] ss:$8 sps:$4 sm:$0xff]   ;;  %v717_v22 = vld [vmem:[#allocation7 + $0x60] ss:$8 sps:$4 sm:$0xff]   ;;  %v718_v23 = vld [vmem:[#allocation7 + $0x74] ss:$8 sps:$4 sm:$0xff]  }
  0x51   :  { %v720_v24 = vld [vmem:[#allocation7 + $0x70] ss:$8 sps:$4 sm:$0xff]   ;;  %v721_v25 = vld [vmem:[#allocation7 + $0x84] ss:$8 sps:$4 sm:$0xff]   ;;  %v723_v26 = vld [vmem:[#allocation7 + $0x80] ss:$8 sps:$4 sm:$0xff]  }
  0x52   :  { %371 = vmatpush1.bf16.msra.mxu1 %v702_v11  ;;  %v724_v27 = vld [vmem:[#allocation7 + $0x94] ss:$8 sps:$4 sm:$0xff]   ;;  %v726_v28 = vld [vmem:[#allocation7 + $0x90] ss:$8 sps:$4 sm:$0xff]   ;;  %v727_v29 = vld [vmem:[#allocation7 + $0xa4] ss:$8 sps:$4 sm:$0xff]  }
  0x53   :  { %609 = vmatmul.mubr.msk.bf16.vlgmr.msra.gmra.mrb[0].mxu0 %vm107_vm1, %v76_v12  ;;  %372 = vmatprep.subr.bf16.mxu1 %v703_v13  ;;  %v729_v30 = vld [vmem:[#allocation7 + $0xa0] ss:$8 sps:$4 sm:$0xff]   ;;  %v730_v31 = vld [vmem:[#allocation7 + $0xb4] ss:$8 sps:$4 sm:$0xff]   ;;  %v732_v32 = vld [vmem:[#allocation7 + $0xb0] ss:$8 sps:$4 sm:$0xff]  }
  0x54   :  { %v733_v33 = vld [vmem:[#allocation7 + $0xc4] ss:$8 sps:$4 sm:$0xff]   ;;  %v735_v34 = vld [vmem:[#allocation7 + $0xc0] ss:$8 sps:$4 sm:$0xff]   ;;  %v736_v35 = vld [vmem:[#allocation7 + $0xd4] ss:$8 sps:$4 sm:$0xff]  }
  0x55   :  { %v738_v36 = vld [vmem:[#allocation7 + $0xd0] ss:$8 sps:$4 sm:$0xff]   ;;  %v739_v37 = vld [vmem:[#allocation7 + $0xe4] ss:$8 sps:$4 sm:$0xff]   ;;  %v741_v38 = vld [vmem:[#allocation7 + $0xe0] ss:$8 sps:$4 sm:$0xff]  }
  0x56   :  { %373 = vmatpush1.bf16.msra.mxu1 %v705_v14  ;;  %v742_v39 = vld [vmem:[#allocation7 + $0xf4] ss:$8 sps:$4 sm:$0xff]   ;;  %v744_v40 = vld [vmem:[#allocation7 + $0xf0] ss:$8 sps:$4 sm:$0xff]   ;;  %v745_v41 = vld [vmem:[#allocation8 + $0x40] sm:$0xff]   ;;  %v83_v54 = vshrl.u32 %v82_v53, 7 }
  0x57   :  { %374 = vmatprep.subr.bf16.mxu1 %v706_v15  ;;  %v746_v42 = vld [vmem:[#allocation8] sm:$0xff]   ;;  %v747_v43 = vld [vmem:[#allocation8 + $0x48] sm:$0xff]   ;;  %660 = vmatprep.subr.bf16.mxu0 %v745_v41  ;;  %v749_v45 = vld [vmem:[#allocation8 + $0x50] sm:$0xff]   ;;  %s888_s21 = smov [#allocation10]  }
  0x58   :  { %661 = vmatpush3.bf16.msra.mxu0 %v746_v42  ;;  %v748_v44 = vld [vmem:[#allocation8 + $0x8] sm:$0xff]   ;;  %v750_v46 = vld [vmem:[#allocation8 + $0x10] sm:$0xff]   ;;  %v751_v47 = vld [vmem:[#allocation8 + $0x58] sm:$0xff]   ;;  %v84_v55 = vsub.s32 0, %v83_v54  ;;  %v88_v57 = vsub.s32 1, %v83_v54  ;;  %s593_s22 = sshll.u32 %s888_s21, 4  ;;  %s594_s22 = int_to_ptr.vmem [resolvable:$true] %s593_s22 }
  0x59   :  { %662 = vmatprep.subr.bf16.mxu0 %v747_v43  ;;  %v752_v48 = vld [vmem:[#allocation8 + $0x18] sm:$0xff]   ;;  %v753_v49 = vld [vmem:[#allocation8 + $0x60] sm:$0xff]   ;;  %v755_v51 = vld [vmem:[#allocation8 + $0x68] sm:$0xff]   ;;  %s849_s23 = scalar_lea.vmem %s594_s22, 128  ;;  %p854_p5 = scmp.lt.s32.totalorder %s594_s22, %s594_s22 }
  0x5a   :  { %375 = vmatpush1.bf16.msra.mxu1 %v708_v16  ;;  %v754_v50 = vld [vmem:[#allocation8 + $0x20] sm:$0xff]   ;;  %v756_v52 = vld [vmem:[#allocation8 + $0x28] sm:$0xff]   ;;  %v757_v6 = vld [vmem:[#allocation8 + $0x70] sm:$0xff]   ;;  %p850_p4 = scmp.ne.s32.totalorder %s594_s22, %s849_s23  ;;  %p855_p6 = scmp.lt.s32.totalorder %s849_s23, %s849_s23 }
  0x5b   :  { %376 = vmatprep.subr.bf16.mxu1 %v709_v17  ;;  %v80_v56 = vld [vmem:[%s998_s4] ss:$4 sm:$0x3]  ;;  %v758_v7 = vld [vmem:[#allocation8 + $0x30] sm:$0xff]   ;;  %v759_v8 = vld [vmem:[#allocation8 + $0x78] sm:$0xff]  }
  0x5c   :  { %663 = vmatpush3.bf16.msra.mxu0 %v748_v44  ;;  %v85_v58 = vrot.slane %v80_v56, %v84_v55  ;;  %v89_v59 = vrot.slane %v80_v56, %v88_v57  ;;  %v760_v9 = vld [vmem:[#allocation8 + $0x38] sm:$0xff]   ;;  %v610_v10 = vld [vmem:[%s998_s4 + $0x1] ss:$4 sm:$0x3]  ;;  %p856_p7 = por %p855_p6, %p854_p5 }
  0x5d   :  { %664 = vmatprep.subr.bf16.mxu0 %v749_v45  ;;  %v201_v11 = vrot.slane %v610_v10, %v84_v55  ;;  %v205_v12 = vrot.slane %v610_v10, %v88_v57 }
  0x5e   :  { %377 = vmatpush1.bf16.msra.mxu1 %v711_v18  ;;  %p857_p8 = pnand %p856_p7, %p850_p4 }
  0x5f   :  { %378 = vmatprep.subr.bf16.mxu1 %v712_v19 }
  0x60   :  { %665 = vmatpush3.bf16.msra.mxu0 %v750_v46 }
  0x61   :  { %666 = vmatprep.subr.bf16.mxu0 %v751_v47 }
  0x62   :  { %379 = vmatpush1.bf16.msra.mxu1 %v714_v20 }
  0x63   :  { %380 = vmatprep.subr.bf16.mxu1 %v715_v21 }
  0x64   :  { %667 = vmatpush3.bf16.msra.mxu0 %v752_v48 }
  0x65   :  { %668 = vmatprep.subr.bf16.mxu0 %v753_v49 }
  0x66   :  { %381 = vmatpush1.bf16.msra.mxu1 %v717_v22 }
  0x67   :  { %382 = vmatprep.subr.bf16.mxu1 %v718_v23 }
  0x68   :  { %669 = vmatpush3.bf16.msra.mxu0 %v754_v50 }
  0x69   :  { %670 = vmatprep.subr.bf16.mxu0 %v755_v51 }
  0x6a   :  { %383 = vmatpush1.bf16.msra.mxu1 %v720_v24  ;;  %v643_v24 = vld [vmem:[%s998_s4 + $0x2] ss:$0 sm:$0xff] }
  0x6b   :  { %384 = vmatprep.subr.bf16.mxu1 %v721_v25 }
  0x6c   :  { %671 = vmatpush3.bf16.msra.mxu0 %v756_v52 }
  0x6d   :  { %672 = vmatprep.subr.bf16.mxu0 %v757_v6 }
  0x6e   :  { %385 = vmatpush1.bf16.msra.mxu1 %v723_v26 }
  0x6f   :  { %386 = vmatprep.subr.bf16.mxu1 %v724_v27 }
  0x70   :  { %673 = vmatpush3.bf16.msra.mxu0 %v758_v7 }
  0x71   :  { %674 = vmatprep.subr.bf16.mxu0 %v759_v8 }
  0x72   :  { %387 = vmatpush1.bf16.msra.mxu1 %v726_v28 }
  0x73   :  { %388 = vmatprep.subr.bf16.mxu1 %v727_v29 }
  0x74   :  { %675 = vmatpush3.bf16.msra.mxu0 %v760_v9 }
  0x76   :  { %389 = vmatpush1.bf16.msra.mxu1 %v729_v30 }
  0x77   :  { %390 = vmatprep.subr.bf16.mxu1 %v730_v31 }
  0x7a   :  { %391 = vmatpush1.bf16.msra.mxu1 %v732_v32 }
  0x7b   :  { %392 = vmatprep.subr.bf16.mxu1 %v733_v33 }
  0x7e   :  { %393 = vmatpush1.bf16.msra.mxu1 %v735_v34 }
  0x7f   :  { %394 = vmatprep.subr.bf16.mxu1 %v736_v35 }
  0x82   :  { %395 = vmatpush1.bf16.msra.mxu1 %v738_v36 }
  0x83   :  { %396 = vmatprep.subr.bf16.mxu1 %v739_v37 }
  0x86   :  { %397 = vmatpush1.bf16.msra.mxu1 %v741_v38 }
  0x87   :  { %398 = vmatprep.subr.bf16.mxu1 %v742_v39 }
  0x8a   :  { %399 = vmatpush1.bf16.msra.mxu1 %v744_v40 }
 0x126   :  { %v152_v60 = vpop.f32.mrb[0].mxu0 }
 0x127   :  { %v153_v61 = vadd.f32 %v152_v60, %v85_v58  ;;  %v154_v62 = vpop.f32.mrb[1].mxu0 }
 0x128   :  { %v155_v63 = vadd.f32 %v154_v62, %v89_v59  ;;  %v156_v0 = vpop.f32.mrb[2].mxu0 }
 0x129   :  { %v159_v1 = vmax.f32 %v153_v61, 0.0  ;;  %v157_v2 = vpop.f32.mrb[3].mxu0 }
 0x12a   :  { %v160_v3 = vmax.f32 %v155_v63, 0.0 }
 0x12b   :  { %v161_v5 = vpack.c.bf16 %v159_v1, %v159_v1 }
 0x12c   :  { %v162_v4 = vpack.c.bf16 %v160_v3, %v160_v3 }
 0x12e   :  { %400 = vmatprep.mubr.bf16.mxu1 %v162_v4 }
 0x12f   :  { %401 = vmatmul.mubr.bf16.vlgmr.msra.gmra.mrb[0].mxu1 %v161_v5 }
 0x202   :  { %v402_v13 = vpop.f32.mrb[0].mxu1 }
 0x203   :  { %v403_v14 = vadd.f32 %v402_v13, %v201_v11  ;;  %v404_v15 = vpop.f32.mrb[1].mxu1 }
 0x204   :  { %v405_v16 = vadd.f32 %v404_v15, %v205_v12  ;;  %v406_v17 = vpop.f32.mrb[2].mxu1 }
 0x205   :  { %v409_v18 = vmax.f32 %v403_v14, 0.0  ;;  %v407_v19 = vpop.f32.mrb[3].mxu1 }
 0x206   :  { %v410_v20 = vmax.f32 %v405_v16, 0.0 }
 0x207   :  { %v411_v22 = vpack.c.bf16 %v409_v18, %v409_v18 }
 0x208   :  { %v412_v21 = vpack.c.bf16 %v410_v20, %v410_v20 }
 0x20a   :  { %578 = vmatprep.mubr.bf16.mxu0 %v412_v21 }
 0x20b   :  { %579 = vmatmul.mubr.bf16.vlgmr.msra.gmra.mrb[4].mxu0 %v411_v22 }
 0x2de   :  { %v676_v23 = vpop.f32.mrb[4].mxu0 }
 0x2df   :  { %v677_v25 = vpop.f32.mrb[5].mxu0 }
 0x2e0   :  { %v678_v26 = vadd.f32 %v677_v25, %v676_v23  ;;  %v679_v27 = vpop.f32.mrb[6].mxu0 }
 0x2e1   :  { %v680_v28 = vpop.f32.mrb[7].mxu0 }
 0x2e2   :  { %v581_v29 = vadd.f32 %v678_v26, %v643_v24 }
 0x2e4   :  { %586 = vst [vmem:[#allocation10] sm:$0xff] %v581_v29 }
 0x2e5   :  { %860 = shalt.err (!%p857_p8)
}
 0x2e6   :  { %s861_s4 = scalar_lea.hbm %s999_s5, 128 }
 0x2e7   :  { %p862_p9 = scmp.ne.s32.totalorder %s999_s5, %s861_s4  ;;  %p865_p10 = scmp.lt.u32.totalorder %s861_s4, %s999_s5 }
 0x2e9   :  { %p867_p11 = pnand %p865_p10, %p862_p9 }
 0x2eb   :  { %870 = shalt.err (!%p867_p11)
}
 0x2ec   :  { %596 = dma.vmem_to_hbm [thread:$0]  %s594_s22, 128, %s999_s5, [#allocation4]  }
 0x2ed   :  { %877 = dma.done.wait [#allocation4], 128  }
 0x2ee   :  { %878 = vsyncadd [#allocation4], 4294967168 }
 0x2ef   :  { %600 = vsyncpa [#allocation3], 1 }
 0x2f0   :  { %601 = vsyncpa [#allocation6], 1 }
 0x2f1   :  { %602 = vsyncpa [#allocation9], 1 }
 0x2f2   :  { %603 = vsyncpa [#allocation4], 1 }

</bundles_post_ra>
